<compile_context>
chip_gen: v5e
topology: v5e:2x2
jax: 0.10.0
libtpu: 0.0.40
codegen_flags: <defaults>
</compile_context>

<pallas_src>
import functools

import jax
import jax.numpy as jnp
from jax.experimental import pallas as pl
from jax.experimental.pallas import tpu as pltpu

NEURONS_PER_LAYER_GENERATOR = 256
NEURONS_PER_LAYER_GENERATOR_EMBEDDING = 128
NZ = 32               # latent (noise) dimension `nz`
BN_EPS = 0.8
LRELU_SLOPE = 0.25
OUT_PAD = 128         # lane-dense padded width for the final output store


def _generator_kernel(kp_ref, nz_ref,
                      w1a_ref, w1b_ref, g1_ref, b1_ref,
                      w2_ref, g2_ref, b2_ref,
                      w3_ref, g3_ref, b3_ref,
                      w4_ref,
                      o_ref):
    """Full Generator MLP forward on one VMEM-resident batch."""
    inv_b = 1.0 / kp_ref.shape[0]   # static Python float (trace-time constant)

    def mm(a, w):
        # bf16 x bf16 on the MXU, f32 accumulation.
        return jnp.dot(a.astype(jnp.bfloat16), w,
                       preferred_element_type=jnp.float32)

    def bn_lrelu(h, gamma, beta):
        # Training-mode BatchNorm1d (biased variance, eps=0.8), f32 math.
        # One-pass stats: var = E[h^2] - mean^2; fold gamma*rsqrt(var+eps) into
        # a single per-feature scale, then hn = h*scale + shift (one FMA pass).
        mean = jnp.sum(h, axis=0, keepdims=True) * inv_b
        ex2 = jnp.sum(h * h, axis=0, keepdims=True) * inv_b
        var = ex2 - mean * mean
        scale = gamma * jax.lax.rsqrt(var + BN_EPS)   # rsqrt -> EUP slot
        shift = beta - mean * scale
        hn = h * scale + shift
        # LeakyReLU(0.25)
        return jnp.where(hn > 0, hn, LRELU_SLOPE * hn)

    # Layer 1: split matmul replaces the concat(keypoints, noise).
    h = mm(kp_ref[...], w1a_ref[...]) + mm(nz_ref[...], w1b_ref[...])
    h = bn_lrelu(h, g1_ref[...], b1_ref[...])

    h = bn_lrelu(mm(h, w2_ref[...]), g2_ref[...], b2_ref[...])
    h = bn_lrelu(mm(h, w3_ref[...]), g3_ref[...], b3_ref[...])

    # Final linear (no bias) into a lane-dense (B, 128) padded output slab.
    o_ref[...] = mm(h, w4_ref[...])


@functools.partial(jax.jit, static_argnames=())
def generator_forward(keypoints, noise, params):
    """Single pallas_call for the whole MLP; slices the padded output."""
    B = keypoints.shape[0]
    image_size = keypoints.shape[-1]
    (w1a, w1b, g1, b1, w2, g2, b2, w3, g3, b3, w4p) = params

    vmem = pl.BlockSpec(memory_space=pltpu.MemorySpace.VMEM)

    out = pl.pallas_call(
        _generator_kernel,
        out_shape=jax.ShapeDtypeStruct((B, OUT_PAD), jnp.float32),
        in_specs=[vmem] * 13,
        out_specs=vmem,
        # No grid: the whole batch must share one set of BN statistics.
    )(keypoints.astype(jnp.float32), noise.astype(jnp.float32),
      w1a, w1b, g1, b1, w2, g2, b2, w3, g3, b3, w4p)

    return out[:, :image_size]


def init_params(key, num_joints):
    """PyTorch-like uniform +-1/sqrt(fan_in) init. Weights stored as (in, out),
    cast to bf16 for HBM/DMA; BN affine params stay f32. w1 is pre-split into
    the keypoint and noise halves; w4 is zero-padded to 128 output lanes."""
    image_size = num_joints * 2
    d_in = image_size + NZ
    H = NEURONS_PER_LAYER_GENERATOR
    E = NEURONS_PER_LAYER_GENERATOR_EMBEDDING

    ks = jax.random.split(key, 4)

    def linear(k, fan_in, fan_out):
        bound = 1.0 / (fan_in ** 0.5)
        return jax.random.uniform(k, (fan_in, fan_out), jnp.float32, -bound, bound)

    w1 = linear(ks[0], d_in, H)
    w2 = linear(ks[1], H, E)
    w3 = linear(ks[2], E, H)
    w4 = linear(ks[3], H, image_size)

    # Split the first weight so no concat is needed at runtime.
    w1a = w1[:image_size, :]
    w1b = w1[image_size:, :]
    # Zero-pad the last layer to a lane-dense 128-wide output.
    w4p = jnp.zeros((H, OUT_PAD), jnp.float32).at[:, :image_size].set(w4)

    bf16 = jnp.bfloat16
    w1a, w1b, w2, w3, w4p = (w.astype(bf16) for w in (w1a, w1b, w2, w3, w4p))

    g1, b1 = jnp.ones((1, H), jnp.float32), jnp.zeros((1, H), jnp.float32)
    g2, b2 = jnp.ones((1, E), jnp.float32), jnp.zeros((1, E), jnp.float32)
    g3, b3 = jnp.ones((1, H), jnp.float32), jnp.zeros((1, H), jnp.float32)

    return (w1a, w1b, g1, b1, w2, g2, b2, w3, g3, b3, w4p)


def _reference_forward(keypoints, noise, params):
    """Pure-JAX reference computing the identical bf16-weight recipe."""
    (w1a, w1b, g1, b1, w2, g2, b2, w3, g3, b3, w4p) = params
    image_size = keypoints.shape[-1]

    def mm(a, w):
        return jnp.dot(a.astype(jnp.bfloat16), w,
                       preferred_element_type=jnp.float32)

    def bn_lrelu(h, gamma, beta):
        mean = jnp.mean(h, axis=0, keepdims=True)
        var = jnp.mean(jnp.square(h), axis=0, keepdims=True) - mean * mean
        hn = (h - mean) * (gamma / jnp.sqrt(var + BN_EPS)) + beta
        return jnp.where(hn > 0, hn, LRELU_SLOPE * hn)

    kp = keypoints.astype(jnp.float32)
    z = noise.astype(jnp.float32)
    h = bn_lrelu(mm(kp, w1a) + mm(z, w1b), g1, b1)
    h = bn_lrelu(mm(h, w2), g2, b2)
    h = bn_lrelu(mm(h, w3), g3, b3)
    return mm(h, w4p)[:, :image_size]


# TODO(synk): BatchNorm1d running-stats (running_mean/var) updates are a training
# side-effect not reproduced here; they do not affect the forward output.

if __name__ == "__main__":
    num_joints = 8            # -> image_size = 16
    image_size = num_joints * 2
    batch = 8

    key = jax.random.PRNGKey(0)
    k_param, k_kp, k_noise = jax.random.split(key, 3)

    params = init_params(k_param, num_joints)
    keypoints = jax.random.normal(k_kp, (batch, image_size), jnp.float32)
    noise = jax.random.normal(k_noise, (batch, NZ), jnp.float32)

    out = generator_forward(keypoints, noise, params)
    out = jax.block_until_ready(out)

    ref = _reference_forward(keypoints, noise, params)
    assert out.shape == (batch, image_size)
    assert jnp.allclose(out, ref, atol=2e-3, rtol=2e-3), "mismatch vs JAX reference"

    print("KERNEL_OK")
</pallas_src>

<mosaic_0001>
module attributes {stable_mosaic.version = 11 : i64} {
  func.func @_generator_kernel(%arg0: memref<8x16xf32, #tpu.memory_space<vmem>>, %arg1: memref<8x32xf32, #tpu.memory_space<vmem>>, %arg2: memref<16x256xbf16, #tpu.memory_space<vmem>>, %arg3: memref<32x256xbf16, #tpu.memory_space<vmem>>, %arg4: memref<1x256xf32, #tpu.memory_space<vmem>>, %arg5: memref<1x256xf32, #tpu.memory_space<vmem>>, %arg6: memref<256x128xbf16, #tpu.memory_space<vmem>>, %arg7: memref<1x128xf32, #tpu.memory_space<vmem>>, %arg8: memref<1x128xf32, #tpu.memory_space<vmem>>, %arg9: memref<128x256xbf16, #tpu.memory_space<vmem>>, %arg10: memref<1x256xf32, #tpu.memory_space<vmem>>, %arg11: memref<1x256xf32, #tpu.memory_space<vmem>>, %arg12: memref<256x128xbf16, #tpu.memory_space<vmem>>, %arg13: memref<8x128xf32, #tpu.memory_space<vmem>>) attributes {dimension_semantics = [], scalar_prefetch = 0 : i64, scratch_operands = 0 : i64, tpu.core_type = #tpu.core_type<tc>} {
    %c0 = arith.constant 0 : index
    %c0_0 = arith.constant 0 : index
    %0 = vector.load %arg0[%c0, %c0_0] : memref<8x16xf32, #tpu.memory_space<vmem>>, vector<8x16xf32>
    %c0_1 = arith.constant 0 : index
    %c0_2 = arith.constant 0 : index
    %1 = vector.load %arg2[%c0_1, %c0_2] : memref<16x256xbf16, #tpu.memory_space<vmem>>, vector<16x256xbf16>
    %2 = arith.truncf %0 : vector<8x16xf32> to vector<8x16xbf16>
    %cst = arith.constant dense<0.000000e+00> : vector<8x256xf32>
    %3 = tpu.matmul %2, %1, %cst {dimension_numbers = #tpu.dot_dimension_numbers<[1], [0], [0], [1], [0, 0, 1, 1], [], []>} : vector<8x16xbf16>, vector<16x256xbf16>, vector<8x256xf32> -> vector<8x256xf32>
    %c0_3 = arith.constant 0 : index
    %c0_4 = arith.constant 0 : index
    %4 = vector.load %arg1[%c0_3, %c0_4] : memref<8x32xf32, #tpu.memory_space<vmem>>, vector<8x32xf32>
    %c0_5 = arith.constant 0 : index
    %c0_6 = arith.constant 0 : index
    %5 = vector.load %arg3[%c0_5, %c0_6] : memref<32x256xbf16, #tpu.memory_space<vmem>>, vector<32x256xbf16>
    %6 = arith.truncf %4 : vector<8x32xf32> to vector<8x32xbf16>
    %cst_7 = arith.constant dense<0.000000e+00> : vector<8x256xf32>
    %7 = tpu.matmul %6, %5, %cst_7 {dimension_numbers = #tpu.dot_dimension_numbers<[1], [0], [0], [1], [0, 0, 1, 1], [], []>} : vector<8x32xbf16>, vector<32x256xbf16>, vector<8x256xf32> -> vector<8x256xf32>
    %8 = arith.addf %3, %7 : vector<8x256xf32>
    %c0_8 = arith.constant 0 : index
    %c0_9 = arith.constant 0 : index
    %9 = vector.load %arg4[%c0_8, %c0_9] : memref<1x256xf32, #tpu.memory_space<vmem>>, vector<1x256xf32>
    %c0_10 = arith.constant 0 : index
    %c0_11 = arith.constant 0 : index
    %10 = vector.load %arg5[%c0_10, %c0_11] : memref<1x256xf32, #tpu.memory_space<vmem>>, vector<1x256xf32>
    %cst_12 = arith.constant dense<0.000000e+00> : vector<256xf32>
    %11 = vector.multi_reduction <add>, %8, %cst_12 [0] : vector<8x256xf32> to vector<256xf32>
    %12 = vector.shape_cast %11 : vector<256xf32> to vector<1x256xf32>
    %cst_13 = arith.constant 1.250000e-01 : f32
    %13 = vector.broadcast %cst_13 : f32 to vector<1x256xf32>
    %14 = arith.mulf %12, %13 : vector<1x256xf32>
    %15 = arith.mulf %8, %8 : vector<8x256xf32>
    %cst_14 = arith.constant dense<0.000000e+00> : vector<256xf32>
    %16 = vector.multi_reduction <add>, %15, %cst_14 [0] : vector<8x256xf32> to vector<256xf32>
    %17 = vector.shape_cast %16 : vector<256xf32> to vector<1x256xf32>
    %cst_15 = arith.constant 1.250000e-01 : f32
    %18 = vector.broadcast %cst_15 : f32 to vector<1x256xf32>
    %19 = arith.mulf %17, %18 : vector<1x256xf32>
    %20 = arith.mulf %14, %14 : vector<1x256xf32>
    %21 = arith.subf %19, %20 : vector<1x256xf32>
    %cst_16 = arith.constant 8.000000e-01 : f32
    %22 = vector.broadcast %cst_16 : f32 to vector<1x256xf32>
    %23 = arith.addf %21, %22 : vector<1x256xf32>
    %24 = math.rsqrt %23 : vector<1x256xf32>
    %25 = arith.mulf %9, %24 : vector<1x256xf32>
    %26 = arith.mulf %14, %25 : vector<1x256xf32>
    %27 = arith.subf %10, %26 : vector<1x256xf32>
    %28 = vector.broadcast %25 : vector<1x256xf32> to vector<8x256xf32>
    %29 = arith.mulf %8, %28 : vector<8x256xf32>
    %30 = vector.broadcast %27 : vector<1x256xf32> to vector<8x256xf32>
    %31 = arith.addf %29, %30 : vector<8x256xf32>
    %cst_17 = arith.constant 0.000000e+00 : f32
    %32 = vector.broadcast %cst_17 : f32 to vector<8x256xf32>
    %33 = arith.cmpf ogt, %31, %32 : vector<8x256xf32>
    %cst_18 = arith.constant 2.500000e-01 : f32
    %34 = vector.broadcast %cst_18 : f32 to vector<8x256xf32>
    %35 = arith.mulf %34, %31 : vector<8x256xf32>
    %36 = arith.select %33, %31, %35 : vector<8x256xi1>, vector<8x256xf32>
    %c0_19 = arith.constant 0 : index
    %c0_20 = arith.constant 0 : index
    %37 = vector.load %arg6[%c0_19, %c0_20] : memref<256x128xbf16, #tpu.memory_space<vmem>>, vector<256x128xbf16>
    %38 = arith.truncf %36 : vector<8x256xf32> to vector<8x256xbf16>
    %cst_21 = arith.constant dense<0.000000e+00> : vector<8x128xf32>
    %39 = tpu.matmul %38, %37, %cst_21 {dimension_numbers = #tpu.dot_dimension_numbers<[1], [0], [0], [1], [0, 0, 1, 1], [], []>} : vector<8x256xbf16>, vector<256x128xbf16>, vector<8x128xf32> -> vector<8x128xf32>
    %c0_22 = arith.constant 0 : index
    %c0_23 = arith.constant 0 : index
    %40 = vector.load %arg7[%c0_22, %c0_23] : memref<1x128xf32, #tpu.memory_space<vmem>>, vector<1x128xf32>
    %c0_24 = arith.constant 0 : index
    %c0_25 = arith.constant 0 : index
    %41 = vector.load %arg8[%c0_24, %c0_25] : memref<1x128xf32, #tpu.memory_space<vmem>>, vector<1x128xf32>
    %cst_26 = arith.constant dense<0.000000e+00> : vector<128xf32>
    %42 = vector.multi_reduction <add>, %39, %cst_26 [0] : vector<8x128xf32> to vector<128xf32>
    %43 = vector.shape_cast %42 : vector<128xf32> to vector<1x128xf32>
    %cst_27 = arith.constant 1.250000e-01 : f32
    %44 = vector.broadcast %cst_27 : f32 to vector<1x128xf32>
    %45 = arith.mulf %43, %44 : vector<1x128xf32>
    %46 = arith.mulf %39, %39 : vector<8x128xf32>
    %cst_28 = arith.constant dense<0.000000e+00> : vector<128xf32>
    %47 = vector.multi_reduction <add>, %46, %cst_28 [0] : vector<8x128xf32> to vector<128xf32>
    %48 = vector.shape_cast %47 : vector<128xf32> to vector<1x128xf32>
    %cst_29 = arith.constant 1.250000e-01 : f32
    %49 = vector.broadcast %cst_29 : f32 to vector<1x128xf32>
    %50 = arith.mulf %48, %49 : vector<1x128xf32>
    %51 = arith.mulf %45, %45 : vector<1x128xf32>
    %52 = arith.subf %50, %51 : vector<1x128xf32>
    %cst_30 = arith.constant 8.000000e-01 : f32
    %53 = vector.broadcast %cst_30 : f32 to vector<1x128xf32>
    %54 = arith.addf %52, %53 : vector<1x128xf32>
    %55 = math.rsqrt %54 : vector<1x128xf32>
    %56 = arith.mulf %40, %55 : vector<1x128xf32>
    %57 = arith.mulf %45, %56 : vector<1x128xf32>
    %58 = arith.subf %41, %57 : vector<1x128xf32>
    %59 = vector.broadcast %56 : vector<1x128xf32> to vector<8x128xf32>
    %60 = arith.mulf %39, %59 : vector<8x128xf32>
    %61 = vector.broadcast %58 : vector<1x128xf32> to vector<8x128xf32>
    %62 = arith.addf %60, %61 : vector<8x128xf32>
    %cst_31 = arith.constant 0.000000e+00 : f32
    %63 = vector.broadcast %cst_31 : f32 to vector<8x128xf32>
    %64 = arith.cmpf ogt, %62, %63 : vector<8x128xf32>
    %cst_32 = arith.constant 2.500000e-01 : f32
    %65 = vector.broadcast %cst_32 : f32 to vector<8x128xf32>
    %66 = arith.mulf %65, %62 : vector<8x128xf32>
    %67 = arith.select %64, %62, %66 : vector<8x128xi1>, vector<8x128xf32>
    %c0_33 = arith.constant 0 : index
    %c0_34 = arith.constant 0 : index
    %68 = vector.load %arg9[%c0_33, %c0_34] : memref<128x256xbf16, #tpu.memory_space<vmem>>, vector<128x256xbf16>
    %69 = arith.truncf %67 : vector<8x128xf32> to vector<8x128xbf16>
    %cst_35 = arith.constant dense<0.000000e+00> : vector<8x256xf32>
    %70 = tpu.matmul %69, %68, %cst_35 {dimension_numbers = #tpu.dot_dimension_numbers<[1], [0], [0], [1], [0, 0, 1, 1], [], []>} : vector<8x128xbf16>, vector<128x256xbf16>, vector<8x256xf32> -> vector<8x256xf32>
    %c0_36 = arith.constant 0 : index
    %c0_37 = arith.constant 0 : index
    %71 = vector.load %arg10[%c0_36, %c0_37] : memref<1x256xf32, #tpu.memory_space<vmem>>, vector<1x256xf32>
    %c0_38 = arith.constant 0 : index
    %c0_39 = arith.constant 0 : index
    %72 = vector.load %arg11[%c0_38, %c0_39] : memref<1x256xf32, #tpu.memory_space<vmem>>, vector<1x256xf32>
    %cst_40 = arith.constant dense<0.000000e+00> : vector<256xf32>
    %73 = vector.multi_reduction <add>, %70, %cst_40 [0] : vector<8x256xf32> to vector<256xf32>
    %74 = vector.shape_cast %73 : vector<256xf32> to vector<1x256xf32>
    %cst_41 = arith.constant 1.250000e-01 : f32
    %75 = vector.broadcast %cst_41 : f32 to vector<1x256xf32>
    %76 = arith.mulf %74, %75 : vector<1x256xf32>
    %77 = arith.mulf %70, %70 : vector<8x256xf32>
    %cst_42 = arith.constant dense<0.000000e+00> : vector<256xf32>
    %78 = vector.multi_reduction <add>, %77, %cst_42 [0] : vector<8x256xf32> to vector<256xf32>
    %79 = vector.shape_cast %78 : vector<256xf32> to vector<1x256xf32>
    %cst_43 = arith.constant 1.250000e-01 : f32
    %80 = vector.broadcast %cst_43 : f32 to vector<1x256xf32>
    %81 = arith.mulf %79, %80 : vector<1x256xf32>
    %82 = arith.mulf %76, %76 : vector<1x256xf32>
    %83 = arith.subf %81, %82 : vector<1x256xf32>
    %cst_44 = arith.constant 8.000000e-01 : f32
    %84 = vector.broadcast %cst_44 : f32 to vector<1x256xf32>
    %85 = arith.addf %83, %84 : vector<1x256xf32>
    %86 = math.rsqrt %85 : vector<1x256xf32>
    %87 = arith.mulf %71, %86 : vector<1x256xf32>
    %88 = arith.mulf %76, %87 : vector<1x256xf32>
    %89 = arith.subf %72, %88 : vector<1x256xf32>
    %90 = vector.broadcast %87 : vector<1x256xf32> to vector<8x256xf32>
    %91 = arith.mulf %70, %90 : vector<8x256xf32>
    %92 = vector.broadcast %89 : vector<1x256xf32> to vector<8x256xf32>
    %93 = arith.addf %91, %92 : vector<8x256xf32>
    %cst_45 = arith.constant 0.000000e+00 : f32
    %94 = vector.broadcast %cst_45 : f32 to vector<8x256xf32>
    %95 = arith.cmpf ogt, %93, %94 : vector<8x256xf32>
    %cst_46 = arith.constant 2.500000e-01 : f32
    %96 = vector.broadcast %cst_46 : f32 to vector<8x256xf32>
    %97 = arith.mulf %96, %93 : vector<8x256xf32>
    %98 = arith.select %95, %93, %97 : vector<8x256xi1>, vector<8x256xf32>
    %c0_47 = arith.constant 0 : index
    %c0_48 = arith.constant 0 : index
    %99 = vector.load %arg12[%c0_47, %c0_48] : memref<256x128xbf16, #tpu.memory_space<vmem>>, vector<256x128xbf16>
    %100 = arith.truncf %98 : vector<8x256xf32> to vector<8x256xbf16>
    %cst_49 = arith.constant dense<0.000000e+00> : vector<8x128xf32>
    %101 = tpu.matmul %100, %99, %cst_49 {dimension_numbers = #tpu.dot_dimension_numbers<[1], [0], [0], [1], [0, 0, 1, 1], [], []>} : vector<8x256xbf16>, vector<256x128xbf16>, vector<8x128xf32> -> vector<8x128xf32>
    %c0_50 = arith.constant 0 : index
    %c0_51 = arith.constant 0 : index
    %102 = vector.load %arg13[%c0_50, %c0_51] : memref<8x128xf32, #tpu.memory_space<vmem>>, vector<8x128xf32>
    tpu.vector_store %arg13[%c0_50, %c0_51], %101 {strides = array<i32>} : memref<8x128xf32, #tpu.memory_space<vmem>>, vector<8x128xf32>,
    return
  }
}

</mosaic_0001>

<bundles_post_ra>
// kernel: generator_forward.1
= control target key start
LH: loop header
LB: loop body
LE: loop exit
PB: predicated region body
PF: predicated region fallthrough
CT: control target
= control target key end

     0   :  { %18 = vsyncpa [#allocation3], 0  ;;  %s1679_s0 = inlined_call_operand.hbm [shape: f32[8,16], index: 0, kind: input, shape index: {}]   ;;  %s1680_s1 = inlined_call_operand.hbm [shape: f32[8,32], index: 1, kind: input, shape index: {}]   ;;  %s1681_s2 = inlined_call_operand.hbm [shape: bf16[16,256], index: 2, kind: input, shape index: {}]   ;;  %s1682_s3 = inlined_call_operand.hbm [shape: bf16[32,256], index: 3, kind: input, shape index: {}]   ;;  %s1683_s4 = inlined_call_operand.vmem [shape: f32[1,256], index: 4, kind: input, shape index: {}]   ;;  %s1684_s5 = inlined_call_operand.vmem [shape: f32[1,256], index: 5, kind: input, shape index: {}]   ;;  %s1685_s6 = inlined_call_operand.hbm [shape: bf16[256,128], index: 6, kind: input, shape index: {}]   ;;  %s1686_s7 = inlined_call_operand.hbm [shape: f32[1,128], index: 7, kind: input, shape index: {}]   ;;  %s1687_s8 = inlined_call_operand.hbm [shape: f32[1,128], index: 8, kind: input, shape index: {}]   ;;  %s1688_s9 = inlined_call_operand.hbm [shape: bf16[128,256], index: 9, kind: input, shape index: {}]   ;;  %s1689_s10 = inlined_call_operand.vmem [shape: f32[1,256], index: 10, kind: input, shape index: {}]   ;;  %s1690_s11 = inlined_call_operand.vmem [shape: f32[1,256], index: 11, kind: input, shape index: {}]   ;;  %s1691_s12 = inlined_call_operand.hbm [shape: bf16[256,128], index: 12, kind: input, shape index: {}]   ;;  %s1692_s13 = inlined_call_operand.hbm [shape: f32[8,128], index: 13, kind: output, shape index: {}]  }
   0x1   :  { %19 = vsyncpa [#allocation6], 0 }
   0x2   :  { %20 = vsyncpa [#allocation9], 0 }
   0x3   :  { %21 = vsyncpa [#allocation12], 0 }
   0x4   :  { %22 = vsyncpa [#allocation15], 0  ;;  %s40_s27 = sshll.u32 %s1680_s1, 4  ;;  %s41_s27 = int_to_ptr.hbm [resolvable:$true] %s40_s27 }
   0x5   :  { %23 = vsyncpa [#allocation4], 0  ;;  %s1514_s28 = smov [#allocation5]   ;;  %s63_s15 = sshll.u32 %s1682_s3, 4  ;;  %s64_s15 = int_to_ptr.hbm [resolvable:$true] %s63_s15 }
   0x6   :  { %s42_s29 = sshll.u32 %s1514_s28, 4  ;;  %s1515_s16 = smov [#allocation8]   ;;  %s43_s29 = int_to_ptr.vmem [resolvable:$true] %s42_s29 }
   0x7   :  { %45 = dma.hbm_to_vmem [thread:$0]  %s41_s27, 128, %s43_s29, [#allocation6]  }
   0x8   :  { %s65_s17 = sshll.u32 %s1515_s16, 4  ;;  %s94_s20 = sshll.u32 %s1686_s7, 4  ;;  %s66_s17 = int_to_ptr.vmem [resolvable:$true] %s65_s17  ;;  %s95_s20 = int_to_ptr.hbm [resolvable:$true] %s94_s20 }
   0x9   :  { %s1516_s1 = smov 128   ;;  %s1517_s21 = smov 8  }
   0xa   :  { %71 = dma.hbm_to_vmem [thread:$0]  %s64_s15, 512, %s66_s17, [#allocation9], %s1516_s1, %s1516_s1, %s1517_s21  }
   0xb   :  { %s115_s24 = sshll.u32 %s1688_s9, 4  ;;  %s1518_s25 = smov [#allocation11]   ;;  %s116_s24 = int_to_ptr.hbm [resolvable:$true] %s115_s24 }
   0xc   :  { %s96_s26 = sshll.u32 %s1518_s25, 4  ;;  %s1519_s3 = smov [#allocation14]   ;;  %s97_s26 = int_to_ptr.vmem [resolvable:$true] %s96_s26 }
   0xd   :  { %99 = dma.hbm_to_vmem [thread:$0]  %s95_s20, 16, %s97_s26, [#allocation12]  }
   0xe   :  { %s117_s27 = sshll.u32 %s1519_s3, 4  ;;  %s29_s7 = sshll.u32 %s1679_s0, 4  ;;  %s118_s27 = int_to_ptr.vmem [resolvable:$true] %s117_s27  ;;  %s30_s7 = int_to_ptr.hbm [resolvable:$true] %s29_s7 }
   0xf   :  { %123 = dma.hbm_to_vmem [thread:$0]  %s116_s24, 2048, %s118_s27, [#allocation15], %s1516_s1, %s1516_s1, %s1517_s21  }
  0x10   :  { %s50_s15 = sshll.u32 %s1681_s2, 4  ;;  %s1520_s16 = smov [#allocation2]   ;;  %s51_s15 = int_to_ptr.hbm [resolvable:$true] %s50_s15 }
  0x11   :  { %s31_s9 = sshll.u32 %s1520_s16, 4  ;;  %s1521_s17 = smov [#allocation7]   ;;  %s32_s9 = int_to_ptr.vmem [resolvable:$true] %s31_s9 }
  0x12   :  { %34 = dma.hbm_to_vmem [thread:$0]  %s30_s7, 128, %s32_s9, [#allocation3]  }
  0x13   :  { %s52_s18 = sshll.u32 %s1521_s17, 4  ;;  %s80_s22 = sshll.u32 %s1685_s6, 4  ;;  %s53_s18 = int_to_ptr.vmem [resolvable:$true] %s52_s18  ;;  %s81_s22 = int_to_ptr.hbm [resolvable:$true] %s80_s22 }
  0x14   :  { %58 = dma.hbm_to_vmem [thread:$0]  %s51_s15, 256, %s53_s18, [#allocation6], %s1516_s1, %s1516_s1, %s1517_s21  }
  0x15   :  { %s1522_s0 = smov [#allocation10]   ;;  %s105_s2 = sshll.u32 %s1687_s8, 4  ;;  %s106_s2 = int_to_ptr.hbm [resolvable:$true] %s105_s2 }
  0x16   :  { %s82_s23 = sshll.u32 %s1522_s0, 4  ;;  %s1523_s26 = smov 64   ;;  %s83_s23 = int_to_ptr.vmem [resolvable:$true] %s82_s23 }
  0x17   :  { %s1524_s3 = smov 4   ;;  %s1525_s27 = smov [#allocation13]  }
  0x18   :  { %88 = dma.hbm_to_vmem [thread:$0]  %s81_s22, 2048, %s83_s23, [#allocation9], %s1523_s26, %s1523_s26, %s1524_s3  }
  0x19   :  { %s107_s28 = sshll.u32 %s1525_s27, 4  ;;  %s132_s6 = sshll.u32 %s1691_s12, 4  ;;  %s108_s28 = int_to_ptr.vmem [resolvable:$true] %s107_s28  ;;  %s133_s6 = int_to_ptr.hbm [resolvable:$true] %s132_s6 }
  0x1a   :  { %110 = dma.hbm_to_vmem [thread:$0]  %s106_s2, 16, %s108_s28, [#allocation12]  }
  0x1b   :  { %s1526_s1 = smov [#allocation16]  }
  0x1c   :  { %s134_s21 = sshll.u32 %s1526_s1, 4  ;;  %s135_s21 = int_to_ptr.vmem [resolvable:$true] %s134_s21 }
  0x1d   :  { %140 = dma.hbm_to_vmem [thread:$0]  %s133_s6, 2048, %s135_s21, [#allocation15], %s1523_s26, %s1523_s26, %s1524_s3  }
  0x1e   :  { %1502 = dma.done.wait [#allocation3], 128  }
  0x1f   :  { %1503 = vsyncadd [#allocation3], 4294967168 }
  0x20   :  { %1504 = dma.done.wait [#allocation6], 384  }
  0x21   :  { %1505 = vsyncadd [#allocation6], 4294966912 }
  0x22   :  { %1506 = dma.done.wait [#allocation9], 2560  }
  0x23   :  { %1507 = vsyncadd [#allocation9], 4294964736 }
  0x24   :  { %1508 = dma.done.wait [#allocation12], 32  }
  0x25   :  { %1509 = vsyncadd [#allocation12], 4294967264 }
  0x26   :  { %1510 = dma.done.wait [#allocation15], 4096  }
  0x27   :  { %1511 = vsyncadd [#allocation15], 4294963200  ;;  %v974_v0 = vld [vmem:[#allocation8 + $0x10] sm:$0xf]  ;;  %v1189_v1 = vld [vmem:[#allocation8 + $0x14] sm:$0xf0] }
  0x28   :  { %v1188_v2 = vld [vmem:[#allocation8 + $0x14] sm:$0xf]  ;;  %v975_v3 = vor.u32 %v1189_v1, %v974_v0  ;;  %v976_v4 = vld [vmem:[#allocation8 + $0x18] sm:$0xf0]  ;;  %v966_v5 = vld [vmem:[#allocation8] sm:$0xf] }
  0x29   :  { %v1187_v6 = vld [vmem:[#allocation8 + $0x4] sm:$0xf0]  ;;  %v979_v7 = vor.u32 %v1188_v2, %v976_v4  ;;  %v1186_v8 = vld [vmem:[#allocation8 + $0x4] sm:$0xf]  ;;  %v968_v9 = vld [vmem:[#allocation8 + $0x8] sm:$0xf0] }
  0x2a   :  { %v182_v10 = vld [vmem:[#allocation5] sm:$0xff]  ;;  %218 = vmatpush.bf16.msra.mxu0 %v975_v3  ;;  %v967_v11 = vor.u32 %v1187_v6, %v966_v5  ;;  %v1184_v12 = vld [vmem:[#allocation7 + $0x4] sm:$0xf]  ;;  %v986_v13 = vld [vmem:[#allocation7 + $0x8] sm:$0xf0]  ;;  %v971_v15 = vor.u32 %v1186_v8, %v968_v9  ;;  %vm208_vm0 = vcmask 261120  }
  0x2b   :  { %v984_v14 = vld [vmem:[#allocation7] sm:$0xf]  ;;  %231 = vmatpush.bf16.msra.mxu1 %v979_v7  ;;  %v1185_v16 = vld [vmem:[#allocation7 + $0x4] sm:$0xf0]  ;;  %v989_v17 = vor.u32 %v1184_v12, %v986_v13  ;;  %v187_v19 = vpack.c.bf16 %v182_v10, %v182_v10  ;;  %v178_v20 = vld [vmem:[#allocation2] sm:$0xff]  ;;  %vm248_vm1 = vcmask 130048  }
  0x2c   :  { %v985_v18 = vor.u32 %v1185_v16, %v984_v14  ;;  %v181_v21 = vpack.c.bf16 %v178_v20, %v178_v20  ;;  %v1197_v27 = vld [vmem:[#allocation10 + $0x38] sm:$0xff]  ;;  %v1196_v34 = vld [vmem:[#allocation10 + $0x30] sm:$0xff]  ;;  %v1195_v42 = vld [vmem:[#allocation10 + $0x28] sm:$0xff]  ;;  %vm339_vm7 = vcmask 1040384   ;;  %s950_s18 = sshll.u32 %s1692_s13, 4  ;;  %s951_s18 = int_to_ptr.hbm [resolvable:$true] %s950_s18 }
  0x2d   :  { %v1205_v28 = vld [vmem:[#allocation10 + $0x78] sm:$0xff]  ;;  %501 = vmatpush.bf16.msra.mxu2 %v1197_v27  ;;  %v1204_v35 = vld [vmem:[#allocation10 + $0x70] sm:$0xff]  ;;  %v1203_v43 = vld [vmem:[#allocation10 + $0x68] sm:$0xff] }
  0x2e   :  { %219 = vmatpush.bf16.msra.mxu0 %v967_v11  ;;  %514 = vmatpush.bf16.msra.mxu3 %v1205_v28  ;;  %v1194_v54 = vld [vmem:[#allocation10 + $0x20] sm:$0xff]  ;;  %v1193_v0 = vld [vmem:[#allocation10 + $0x18] sm:$0xff]  ;;  %v1192_v10 = vld [vmem:[#allocation10 + $0x10] sm:$0xff] }
  0x2f   :  { %232 = vmatpush.bf16.msra.mxu1 %v971_v15  ;;  %v1202_v55 = vld [vmem:[#allocation10 + $0x60] sm:$0xff]  ;;  %v1201_v1 = vld [vmem:[#allocation10 + $0x58] sm:$0xff]  ;;  %v1200_v11 = vld [vmem:[#allocation10 + $0x50] sm:$0xff] }
  0x30   :  { %v1191_v16 = vld [vmem:[#allocation10 + $0x8] sm:$0xff] }
  0x31   :  { %980 = vmatmul.msk.bf16.vlgmr.msra.gmra.mxu0 %vm208_vm0, %v187_v19  ;;  %502 = vmatpush.bf16.msra.mxu2 %v1196_v34 }
  0x32   :  { %259 = vmatpush.bf16.msrb.mxu0 %v985_v18  ;;  %981 = vmatmul.msk.bf16.vlgmr.msra.gmra.mxu1 %vm208_vm0, %v187_v19  ;;  %v1190_v18 = vld [vmem:[#allocation10] sm:$0xff] }
  0x33   :  { %272 = vmatpush.bf16.msrb.mxu1 %v989_v17  ;;  %515 = vmatpush.bf16.msra.mxu3 %v1204_v35  ;;  %v1199_v17 = vld [vmem:[#allocation10 + $0x48] sm:$0xff]  ;;  %v1198_v19 = vld [vmem:[#allocation10 + $0x40] sm:$0xff] }
  0x34   :  { %v278_v35 = vld [vmem:[%s1683_s4] sm:$0x3] }
  0x35   :  { %503 = vmatpush.bf16.msra.mxu2 %v1195_v42 }
  0x37   :  { %516 = vmatpush.bf16.msra.mxu3 %v1203_v43  ;;  %v279_v43 = vld [vmem:[%s1684_s5] sm:$0x3] }
  0x39   :  { %504 = vmatpush.bf16.msra.mxu2 %v1194_v54 }
  0x3b   :  { %517 = vmatpush.bf16.msra.mxu3 %v1202_v55 }
  0x3d   :  { %505 = vmatpush.bf16.msra.mxu2 %v1193_v0 }
  0x3f   :  { %518 = vmatpush.bf16.msra.mxu3 %v1201_v1  ;;  %v1219_v1 = vld [vmem:[#allocation14 + $0x64] sm:$0xf0] }
  0x41   :  { %990 = vmatmul.msk.bf16.vlgmr.msrb.gmra.mxu0 %vm248_vm1, %v181_v21  ;;  %506 = vmatpush.bf16.msra.mxu2 %v1192_v10  ;;  %v1100_v10 = vld [vmem:[#allocation14 + $0x58] sm:$0xf0] }
  0x42   :  { %991 = vmatmul.msk.bf16.vlgmr.msrb.gmra.mxu1 %vm248_vm1, %v181_v21 }
  0x43   :  { %519 = vmatpush.bf16.msra.mxu3 %v1200_v11 }
  0x45   :  { %507 = vmatpush.bf16.msra.mxu2 %v1191_v16  ;;  %v1215_v16 = vld [vmem:[#allocation14 + $0x44] sm:$0xf0] }
  0x47   :  { %520 = vmatpush.bf16.msra.mxu3 %v1199_v17  ;;  %v1214_v17 = vld [vmem:[#allocation14 + $0x44] sm:$0xf] }
  0x49   :  { %508 = vmatpush.bf16.msra.mxu2 %v1190_v18 }
  0x4b   :  { %521 = vmatpush.bf16.msra.mxu3 %v1198_v19 }
  0xae   :  { %v221_v22 = vpop.f32.mrf.mxu0 }
  0xaf   :  { %v234_v23 = vpop.f32.mrf.mxu1 }
  0xb6   :  { %v223_v24 = vpop.f32.mrf.mxu0 }
  0xb7   :  { %v236_v25 = vpop.f32.mrf.mxu1 }
  0xbe   :  { %v261_v26 = vpop.f32.mrf.mxu0 }
  0xbf   :  { %v1625_v29 = vadd.f32 %v261_v26, %v221_v22  ;;  %v274_v30 = vpop.f32.mrf.mxu1 }
  0xc0   :  { %v1627_v31 = vadd.f32 %v274_v30, %v234_v23 }
  0xc1   :  { %v280_v32 = vrot.slane %v1625_v29, 4  ;;  %v294_v33 = vmul.f32 %v1625_v29, %v1625_v29 }
  0xc2   :  { %v286_v36 = vrot.slane %v1627_v31, 4  ;;  %v295_v37 = vmul.f32 %v1627_v31, %v1627_v31 }
  0xc3   :  { %v281_v38 = vadd.f32 %v280_v32, %v1625_v29  ;;  %v296_v39 = vrot.slane %v294_v33, 4 }
  0xc4   :  { %v287_v40 = vadd.f32 %v286_v36, %v1627_v31  ;;  %v302_v41 = vrot.slane %v295_v37, 4 }
  0xc5   :  { %v282_v44 = vrot.slane %v281_v38, 2  ;;  %v297_v45 = vadd.f32 %v296_v39, %v294_v33 }
  0xc6   :  { %v288_v46 = vrot.slane %v287_v40, 2  ;;  %v303_v47 = vadd.f32 %v302_v41, %v295_v37  ;;  %v263_v48 = vpop.f32.mrf.mxu0 }
  0xc7   :  { %v283_v49 = vadd.f32 %v282_v44, %v281_v38  ;;  %v298_v50 = vrot.slane %v297_v45, 2  ;;  %v276_v51 = vpop.f32.mrf.mxu1 }
  0xc8   :  { %v289_v52 = vadd.f32 %v288_v46, %v287_v40  ;;  %v304_v53 = vrot.slane %v303_v47, 2 }
  0xc9   :  { %v284_v56 = vrot.slane %v283_v49, 1  ;;  %v299_v57 = vadd.f32 %v298_v50, %v297_v45 }
  0xca   :  { %v290_v58 = vrot.slane %v289_v52, 1  ;;  %v305_v59 = vadd.f32 %v304_v53, %v303_v47 }
  0xcb   :  { %v285_v60 = vadd.f32 %v284_v56, %v283_v49  ;;  %v300_v61 = vrot.slane %v299_v57, 1 }
  0xcc   :  { %v291_v62 = vadd.f32 %v290_v58, %v289_v52  ;;  %v306_v63 = vrot.slane %v305_v59, 1 }
  0xcd   :  { %v292_v2 = vmul.f32 0.125, %v285_v60  ;;  %v301_v3 = vadd.f32 %v300_v61, %v299_v57  ;;  %v1114_v60 = vld [vmem:[#allocation14 + $0x70] sm:$0xf]  ;;  %v1221_v61 = vld [vmem:[#allocation14 + $0x74] sm:$0xf0] }
  0xce   :  { %v293_v4 = vmul.f32 0.125, %v291_v62  ;;  %v307_v5 = vadd.f32 %v306_v63, %v305_v59  ;;  %v1220_v62 = vld [vmem:[#allocation14 + $0x74] sm:$0xf]  ;;  %v1116_v63 = vld [vmem:[#allocation14 + $0x78] sm:$0xf0] }
  0xcf   :  { %v308_v6 = vmul.f32 0.125, %v301_v3  ;;  %v310_v7 = vmul.f32 %v292_v2, %v292_v2  ;;  %v1119_v0 = vor.u32 %v1220_v62, %v1116_v63  ;;  %v1206_v62 = vld [vmem:[#allocation14 + $0x4] sm:$0xf] }
  0xd0   :  { %v309_v8 = vmul.f32 0.125, %v307_v5  ;;  %v311_v9 = vmul.f32 %v293_v4, %v293_v4 }
  0xd1   :  { %v312_v12 = vsub.f32 %v308_v6, %v310_v7  ;;  %681 = vmatpush.bf16.msra.mxu1 %v1119_v0  ;;  %v1098_v6 = vld [vmem:[#allocation14 + $0x50] sm:$0xf]  ;;  %v1217_v7 = vld [vmem:[#allocation14 + $0x54] sm:$0xf0] }
  0xd2   :  { %v313_v13 = vsub.f32 %v309_v8, %v311_v9  ;;  %v1216_v8 = vld [vmem:[#allocation14 + $0x54] sm:$0xf]  ;;  %v1099_v9 = vor.u32 %v1217_v7, %v1098_v6  ;;  %v527_v6 = vld [vmem:[#allocation11] sm:$0x1] }
  0xd3   :  { %v314_v14 = vadd.f32 0.8, %v312_v12 }
  0xd4   :  { %v315_v15 = vadd.f32 0.8, %v313_v13  ;;  %v1103_v13 = vor.u32 %v1216_v8, %v1100_v10  ;;  %v528_v10 = vld [vmem:[#allocation13] sm:$0x1] }
  0xd5   :  { %1252 = vrsqrt.f32 %v314_v14  ;;  %vm322_vm6 = vweird.f32 %v314_v14 }
  0xd6   :  { %1254 = vrsqrt.f32 %v315_v15  ;;  %vm332_vm4 = vweird.f32 %v315_v15 }
  0xdb   :  { %v1253_v20 = vpop.eup %1252 }
  0xdc   :  { %v1255_v21 = vpop.eup %1254  ;;  %v317_v22 = vmul.f32 %v1253_v20, %v314_v14  ;;  %vm323_vm3 = vweird.f32 %v1253_v20 }
  0xdd   :  { %v327_v23 = vmul.f32 %v1255_v21, %v315_v15  ;;  %vm333_vm2 = vweird.f32 %v1255_v21  ;;  %vm324_vm8 = vmor %vm322_vm6, %vm323_vm3  ;;  %v1090_v15 = vld [vmem:[#allocation14 + $0x40] sm:$0xf] }
  0xde   :  { %v318_v24 = vmul.f32 %v1253_v20, %v317_v22  ;;  %vm334_vm5 = vmor %vm332_vm4, %vm333_vm2 }
  0xdf   :  { %v328_v25 = vmul.f32 %v1255_v21, %v327_v23 }
  0xe0   :  { %v319_v26 = vmul.f32 0.5, %v318_v24 }
  0xe1   :  { %v329_v27 = vmul.f32 0.5, %v328_v25  ;;  %v1082_v25 = vld [vmem:[#allocation14 + $0x30] sm:$0xf] }
  0xe2   :  { %v320_v28 = vsub.f32 1.5, %v319_v26  ;;  %v1213_v26 = vld [vmem:[#allocation14 + $0x34] sm:$0xf0] }
  0xe3   :  { %v330_v30 = vsub.f32 1.5, %v329_v27  ;;  %v1212_v27 = vld [vmem:[#allocation14 + $0x34] sm:$0xf] }
  0xe4   :  { %v321_v32 = vmul.f32 %v1253_v20, %v320_v28 }
  0xe5   :  { %v331_v33 = vmul.f32 %v1255_v21, %v330_v30 }
  0xe6   :  { %v325_v37 = vsel %vm324_vm8, %v1253_v20, %v321_v32  ;;  %v1091_v20 = vor.u32 %v1215_v16, %v1090_v15  ;;  %v1083_v32 = vor.u32 %v1213_v26, %v1082_v25 }
  0xe7   :  { %v335_v34 = vsel %vm334_vm5, %v1255_v21, %v331_v33  ;;  %v1092_v21 = vld [vmem:[#allocation14 + $0x48] sm:$0xf0]  ;;  %v1084_v33 = vld [vmem:[#allocation14 + $0x38] sm:$0xf0] }
  0xe8   :  { %v338_v36 = vrot.slane %v335_v34, 7  ;;  %v1095_v22 = vor.u32 %v1214_v17, %v1092_v21  ;;  %v1229_v21 = vld [vmem:[#allocation16 + $0x38] sm:$0xff] }
  0xe9   :  { %916 = vmatpush.bf16.msrb.mxu2 %v1229_v21 }
  0xea   :  { %v340_v38 = vsel %vm339_vm7, %v325_v37, %v338_v36  ;;  %v1087_v36 = vor.u32 %v1212_v27, %v1084_v33 }
  0xeb   :  { %v342_v39 = vmul.f32 %v340_v38, %v278_v35 }
  0xed   :  { %v344_v40 = vperm.slane %v342_v39, 0  ;;  %v345_v41 = vperm.slane %v342_v39, 1  ;;  %v1074_v39 = vld [vmem:[#allocation14 + $0x20] sm:$0xf] }
  0xef   :  { %v349_v42 = vmul.f32 %v345_v41, %v293_v4  ;;  %v348_v44 = vmul.f32 %v344_v40, %v292_v2  ;;  %v356_v48 = vmul.f32 %v344_v40, %v1625_v29  ;;  %v357_v50 = vmul.f32 %v345_v41, %v1627_v31  ;;  %v1106_v31 = vld [vmem:[#allocation14 + $0x60] sm:$0xf]  ;;  %v1218_v2 = vld [vmem:[#allocation14 + $0x64] sm:$0xf]  ;;  %v1108_v4 = vld [vmem:[#allocation14 + $0x68] sm:$0xf0] }
  0xf0   :  { %v1115_v29 = vor.u32 %v1221_v61, %v1114_v60  ;;  %v1107_v3 = vor.u32 %v1219_v1, %v1106_v31  ;;  %v1111_v5 = vor.u32 %v1218_v2, %v1108_v4  ;;  %v1211_v40 = vld [vmem:[#allocation14 + $0x24] sm:$0xf0]  ;;  %v1210_v41 = vld [vmem:[#allocation14 + $0x24] sm:$0xf] }
  0xf1   :  { %v352_v45 = vrot.slane %v349_v42, 7  ;;  %v1207_v60 = vld [vmem:[#allocation14 + $0x4] sm:$0xf0] }
  0xf2   :  { %668 = vmatpush.bf16.msra.mxu0 %v1115_v29  ;;  %682 = vmatpush.bf16.msra.mxu1 %v1111_v5  ;;  %v1060_v29 = vld [vmem:[#allocation14 + $0x8] sm:$0xf0] }
  0xf3   :  { %v353_v46 = vsel %vm339_vm7, %v348_v44, %v352_v45  ;;  %v1075_v44 = vor.u32 %v1211_v40, %v1074_v39  ;;  %v1076_v45 = vld [vmem:[#allocation14 + $0x28] sm:$0xf0]  ;;  %v1063_v0 = vor.u32 %v1206_v62, %v1060_v29  ;;  %v1225_v62 = vld [vmem:[#allocation16 + $0x18] sm:$0xff] }
  0xf4   :  { %v355_v47 = vsub.f32 %v279_v43, %v353_v46  ;;  %v1079_v46 = vor.u32 %v1210_v41, %v1076_v45  ;;  %v1227_v40 = vld [vmem:[#allocation16 + $0x28] sm:$0xff]  ;;  %v1233_v29 = vld [vmem:[#allocation16 + $0x58] sm:$0xff] }
  0xf5   :  { %v1235_v41 = vld [vmem:[#allocation16 + $0x68] sm:$0xff] }
  0xf6   :  { %v359_v49 = vperm.slane %v355_v47, 0  ;;  %v360_v51 = vperm.slane %v355_v47, 1  ;;  %669 = vmatpush.bf16.msra.mxu0 %v1107_v3  ;;  %683 = vmatpush.bf16.msra.mxu1 %v1103_v13 }
  0xf8   :  { %v363_v52 = vadd.f32 %v359_v49, %v356_v48  ;;  %v364_v53 = vadd.f32 %v360_v51, %v357_v50  ;;  %v1066_v49 = vld [vmem:[#allocation14 + $0x10] sm:$0xf]  ;;  %v1209_v50 = vld [vmem:[#allocation14 + $0x14] sm:$0xf0]  ;;  %v1208_v51 = vld [vmem:[#allocation14 + $0x14] sm:$0xf] }
  0xfa   :  { %vm365_vm9 = vcmp.gt.f32.partialorder %v363_v52, 0.0  ;;  %v367_v54 = vmul.f32 0.25, %v363_v52  ;;  %vm366_vm10 = vcmp.gt.f32.partialorder %v364_v53, 0.0  ;;  %v368_v55 = vmul.f32 0.25, %v364_v53  ;;  %670 = vmatpush.bf16.msra.mxu0 %v1099_v9  ;;  %684 = vmatpush.bf16.msra.mxu1 %v1095_v22  ;;  %v1237_v22 = vld [vmem:[#allocation16 + $0x78] sm:$0xff] }
  0xfb   :  { %929 = vmatpush.bf16.msrb.mxu3 %v1237_v22 }
  0xfc   :  { %v369_v56 = vsel %vm365_vm9, %v363_v52, %v367_v54  ;;  %v370_v57 = vsel %vm366_vm10, %v364_v53, %v368_v55  ;;  %v1067_v54 = vor.u32 %v1209_v50, %v1066_v49  ;;  %v1068_v55 = vld [vmem:[#allocation14 + $0x18] sm:$0xf0] }
  0xfd   :  { %v403_v58 = vpack.c.bf16 %v369_v56, %v369_v56  ;;  %v404_v59 = vpack.c.bf16 %v370_v57, %v370_v57  ;;  %v1071_v56 = vor.u32 %v1208_v51, %v1068_v55 }
  0xfe   :  { %671 = vmatpush.bf16.msra.mxu0 %v1091_v20  ;;  %685 = vmatpush.bf16.msra.mxu1 %v1087_v36 }
  0xff   :  { %509 = vmatmul.bf16.vlgmr.msra.gmra.mxu2 %v403_v58  ;;  %522 = vmatmul.bf16.vlgmr.msra.gmra.mxu3 %v404_v59  ;;  %v1058_v59 = vld [vmem:[#allocation14] sm:$0xf] }
 0x100   :  { %v1059_v61 = vor.u32 %v1207_v60, %v1058_v59 }
 0x102   :  { %672 = vmatpush.bf16.msra.mxu0 %v1083_v32  ;;  %686 = vmatpush.bf16.msra.mxu1 %v1079_v46 }
 0x106   :  { %673 = vmatpush.bf16.msra.mxu0 %v1075_v44  ;;  %687 = vmatpush.bf16.msra.mxu1 %v1071_v56 }
 0x10a   :  { %674 = vmatpush.bf16.msra.mxu0 %v1067_v54  ;;  %688 = vmatpush.bf16.msra.mxu1 %v1063_v0 }
 0x10e   :  { %675 = vmatpush.bf16.msra.mxu0 %v1059_v61 }
 0x182   :  { %v510_v11 = vpop.f32.mrf.mxu2  ;;  %v523_v12 = vpop.f32.mrf.mxu3 }
 0x183   :  { %v1647_v14 = vadd.f32 %v523_v12, %v510_v11 }
 0x185   :  { %v529_v18 = vrot.slane %v1647_v14, 4  ;;  %v536_v19 = vmul.f32 %v1647_v14, %v1647_v14 }
 0x187   :  { %v530_v23 = vadd.f32 %v529_v18, %v1647_v14  ;;  %v537_v24 = vrot.slane %v536_v19, 4 }
 0x189   :  { %v531_v28 = vrot.slane %v530_v23, 2  ;;  %v538_v30 = vadd.f32 %v537_v24, %v536_v19 }
 0x18a   :  { %v512_v34 = vpop.f32.mrf.mxu2  ;;  %v525_v35 = vpop.f32.mrf.mxu3 }
 0x18b   :  { %v532_v37 = vadd.f32 %v531_v28, %v530_v23  ;;  %v539_v38 = vrot.slane %v538_v30, 2  ;;  %v1228_v28 = vld [vmem:[#allocation16 + $0x30] sm:$0xff] }
 0x18c   :  { %917 = vmatpush.bf16.msrb.mxu2 %v1228_v28 }
 0x18d   :  { %v533_v42 = vrot.slane %v532_v37, 1  ;;  %v540_v43 = vadd.f32 %v539_v38, %v538_v30  ;;  %v1236_v30 = vld [vmem:[#allocation16 + $0x70] sm:$0xff] }
 0x18e   :  { %930 = vmatpush.bf16.msrb.mxu3 %v1236_v30 }
 0x18f   :  { %v534_v47 = vadd.f32 %v533_v42, %v532_v37  ;;  %v541_v48 = vrot.slane %v540_v43, 1 }
 0x190   :  { %918 = vmatpush.bf16.msrb.mxu2 %v1227_v40 }
 0x191   :  { %v535_v52 = vmul.f32 0.125, %v534_v47  ;;  %v542_v53 = vadd.f32 %v541_v48, %v540_v43 }
 0x192   :  { %931 = vmatpush.bf16.msrb.mxu3 %v1235_v41 }
 0x193   :  { %v543_v57 = vmul.f32 0.125, %v542_v53  ;;  %v544_v58 = vmul.f32 %v535_v52, %v535_v52  ;;  %v1234_v53 = vld [vmem:[#allocation16 + $0x60] sm:$0xff] }
 0x195   :  { %v545_v63 = vsub.f32 %v543_v57, %v544_v58 }
 0x196   :  { %932 = vmatpush.bf16.msrb.mxu3 %v1234_v53 }
 0x197   :  { %v546_v31 = vadd.f32 0.8, %v545_v63 }
 0x199   :  { %1256 = vrsqrt.f32 %v546_v31  ;;  %vm553_vm12 = vweird.f32 %v546_v31 }
 0x19a   :  { %933 = vmatpush.bf16.msrb.mxu3 %v1233_v29 }
 0x19f   :  { %v1257_v1 = vpop.eup %1256 }
 0x1a0   :  { %v548_v2 = vmul.f32 %v1257_v1, %v546_v31  ;;  %vm554_vm11 = vweird.f32 %v1257_v1 }
 0x1a1   :  { %vm555_vm13 = vmor %vm553_vm12, %vm554_vm11 }
 0x1a2   :  { %v549_v3 = vmul.f32 %v1257_v1, %v548_v2 }
 0x1a4   :  { %v550_v4 = vmul.f32 0.5, %v549_v3 }
 0x1a6   :  { %v551_v5 = vsub.f32 1.5, %v550_v4  ;;  %v1224_v4 = vld [vmem:[#allocation16 + $0x10] sm:$0xff] }
 0x1a8   :  { %v552_v7 = vmul.f32 %v1257_v1, %v551_v5  ;;  %v1232_v5 = vld [vmem:[#allocation16 + $0x50] sm:$0xff] }
 0x1a9   :  { %934 = vmatpush.bf16.msrb.mxu3 %v1232_v5 }
 0x1aa   :  { %v556_v8 = vsel %vm555_vm13, %v1257_v1, %v552_v7 }
 0x1ab   :  { %v557_v9 = vmul.f32 %v556_v8, %v527_v6  ;;  %v1223_v8 = vld [vmem:[#allocation16 + $0x8] sm:$0xff] }
 0x1ad   :  { %v558_v11 = vmul.f32 %v557_v9, %v535_v52  ;;  %v561_v12 = vperm.slane %v557_v9, 0  ;;  %v1226_v52 = vld [vmem:[#allocation16 + $0x20] sm:$0xff]  ;;  %v1231_v9 = vld [vmem:[#allocation16 + $0x48] sm:$0xff] }
 0x1ae   :  { %919 = vmatpush.bf16.msrb.mxu2 %v1226_v52  ;;  %935 = vmatpush.bf16.msrb.mxu3 %v1231_v9 }
 0x1af   :  { %v559_v13 = vsub.f32 %v528_v10, %v558_v11  ;;  %v563_v15 = vmul.f32 %v561_v12, %v1647_v14  ;;  %v1222_v10 = vld [vmem:[#allocation16] sm:$0xff] }
 0x1b0   :  { %v1230_v11 = vld [vmem:[#allocation16 + $0x40] sm:$0xff] }
 0x1b1   :  { %v565_v16 = vperm.slane %v559_v13, 0 }
 0x1b2   :  { %920 = vmatpush.bf16.msrb.mxu2 %v1225_v62  ;;  %936 = vmatpush.bf16.msrb.mxu3 %v1230_v11 }
 0x1b3   :  { %v567_v17 = vadd.f32 %v565_v16, %v563_v15 }
 0x1b5   :  { %vm568_vm14 = vcmp.gt.f32.partialorder %v567_v17, 0.0  ;;  %v569_v18 = vmul.f32 0.25, %v567_v17 }
 0x1b6   :  { %921 = vmatpush.bf16.msrb.mxu2 %v1224_v4 }
 0x1b7   :  { %v570_v19 = vsel %vm568_vm14, %v567_v17, %v569_v18 }
 0x1b8   :  { %v587_v20 = vpack.c.bf16 %v570_v19, %v570_v19 }
 0x1ba   :  { %676 = vmatmul.bf16.vlgmr.msra.gmra.mxu0 %v587_v20  ;;  %689 = vmatmul.bf16.vlgmr.msra.gmra.mxu1 %v587_v20 }
 0x1bb   :  { %922 = vmatpush.bf16.msrb.mxu2 %v1223_v8 }
 0x1bf   :  { %923 = vmatpush.bf16.msrb.mxu2 %v1222_v10 }
 0x237   :  { %v1654_v23 = vpop.f32.mrf.mxu0  ;;  %v1656_v24 = vpop.f32.mrf.mxu1 }
 0x238   :  { %v696_v25 = vrot.slane %v1654_v23, 4  ;;  %v710_v14 = vmul.f32 %v1654_v23, %v1654_v23  ;;  %v702_v26 = vrot.slane %v1656_v24, 4  ;;  %v711_v27 = vmul.f32 %v1656_v24, %v1656_v24 }
 0x23a   :  { %v697_v32 = vadd.f32 %v696_v25, %v1654_v23  ;;  %v712_v33 = vrot.slane %v710_v14, 4  ;;  %v703_v34 = vadd.f32 %v702_v26, %v1656_v24  ;;  %v718_v35 = vrot.slane %v711_v27, 4 }
 0x23c   :  { %v698_v36 = vrot.slane %v697_v32, 2  ;;  %v713_v37 = vadd.f32 %v712_v33, %v710_v14  ;;  %v704_v38 = vrot.slane %v703_v34, 2  ;;  %v719_v39 = vadd.f32 %v718_v35, %v711_v27  ;;  %v694_v27 = vld [vmem:[%s1689_s10] sm:$0x3]  ;;  %s1527_s10 = smov [#allocation17]  }
 0x23e   :  { %v699_v42 = vadd.f32 %v698_v36, %v697_v32  ;;  %v714_v43 = vrot.slane %v713_v37, 2  ;;  %v705_v44 = vadd.f32 %v704_v38, %v703_v34  ;;  %v720_v45 = vrot.slane %v719_v39, 2 }
 0x23f   :  { %v679_v46 = vpop.f32.mrf.mxu0  ;;  %v692_v47 = vpop.f32.mrf.mxu1 }
 0x240   :  { %v700_v48 = vrot.slane %v699_v42, 1  ;;  %v715_v49 = vadd.f32 %v714_v43, %v713_v37  ;;  %v706_v50 = vrot.slane %v705_v44, 1  ;;  %v721_v51 = vadd.f32 %v720_v45, %v719_v39  ;;  %v695_v37 = vld [vmem:[%s1690_s11] sm:$0x3]  ;;  %s948_s11 = sshll.u32 %s1527_s10, 4  ;;  %s949_s11 = int_to_ptr.vmem [resolvable:$true] %s948_s11 }
 0x242   :  { %v701_v54 = vadd.f32 %v700_v48, %v699_v42  ;;  %v716_v55 = vrot.slane %v715_v49, 1  ;;  %v707_v56 = vadd.f32 %v706_v50, %v705_v44  ;;  %v722_v57 = vrot.slane %v721_v51, 1 }
 0x244   :  { %v708_v58 = vmul.f32 0.125, %v701_v54  ;;  %v717_v59 = vadd.f32 %v716_v55, %v715_v49  ;;  %v709_v60 = vmul.f32 0.125, %v707_v56  ;;  %v723_v61 = vadd.f32 %v722_v57, %v721_v51 }
 0x246   :  { %v724_v63 = vmul.f32 0.125, %v717_v59  ;;  %v726_v0 = vmul.f32 %v708_v58, %v708_v58  ;;  %v725_v31 = vmul.f32 0.125, %v723_v61  ;;  %v727_v1 = vmul.f32 %v709_v60, %v709_v60 }
 0x248   :  { %v728_v2 = vsub.f32 %v724_v63, %v726_v0  ;;  %v729_v3 = vsub.f32 %v725_v31, %v727_v1 }
 0x24a   :  { %v730_v6 = vadd.f32 0.8, %v728_v2  ;;  %v731_v7 = vadd.f32 0.8, %v729_v3 }
 0x24c   :  { %1258 = vrsqrt.f32 %v730_v6  ;;  %vm748_vm1 = vweird.f32 %v731_v7  ;;  %vm738_vm3 = vweird.f32 %v730_v6 }
 0x24d   :  { %1260 = vrsqrt.f32 %v731_v7 }
 0x252   :  { %v1259_v12 = vpop.eup %1258 }
 0x253   :  { %v1261_v13 = vpop.eup %1260  ;;  %v733_v15 = vmul.f32 %v1259_v12, %v730_v6  ;;  %vm739_vm0 = vweird.f32 %v1259_v12 }
 0x254   :  { %v743_v16 = vmul.f32 %v1261_v13, %v731_v7  ;;  %vm749_vm15 = vweird.f32 %v1261_v13  ;;  %vm740_vm4 = vmor %vm738_vm3, %vm739_vm0 }
 0x255   :  { %v734_v17 = vmul.f32 %v1259_v12, %v733_v15  ;;  %vm750_vm2 = vmor %vm748_vm1, %vm749_vm15 }
 0x256   :  { %v744_v18 = vmul.f32 %v1261_v13, %v743_v16 }
 0x257   :  { %v735_v19 = vmul.f32 0.5, %v734_v17 }
 0x258   :  { %v745_v20 = vmul.f32 0.5, %v744_v18 }
 0x259   :  { %v736_v21 = vsub.f32 1.5, %v735_v19 }
 0x25a   :  { %v746_v22 = vsub.f32 1.5, %v745_v20 }
 0x25b   :  { %v737_v25 = vmul.f32 %v1259_v12, %v736_v21 }
 0x25c   :  { %v747_v14 = vmul.f32 %v1261_v13, %v746_v22 }
 0x25d   :  { %v741_v30 = vsel %vm740_vm4, %v1259_v12, %v737_v25 }
 0x25e   :  { %v751_v26 = vsel %vm750_vm2, %v1261_v13, %v747_v14 }
 0x25f   :  { %v754_v28 = vrot.slane %v751_v26, 7 }
 0x261   :  { %v755_v32 = vsel %vm339_vm7, %v741_v30, %v754_v28 }
 0x262   :  { %v757_v33 = vmul.f32 %v755_v32, %v694_v27 }
 0x264   :  { %v759_v34 = vperm.slane %v757_v33, 0  ;;  %v760_v35 = vperm.slane %v757_v33, 1 }
 0x266   :  { %v764_v36 = vmul.f32 %v760_v35, %v709_v60  ;;  %v763_v38 = vmul.f32 %v759_v34, %v708_v58  ;;  %v772_v42 = vmul.f32 %v760_v35, %v1656_v24  ;;  %v771_v44 = vmul.f32 %v759_v34, %v1654_v23 }
 0x268   :  { %v767_v39 = vrot.slane %v764_v36, 7 }
 0x26a   :  { %v768_v40 = vsel %vm339_vm7, %v763_v38, %v767_v39 }
 0x26b   :  { %v770_v41 = vsub.f32 %v695_v37, %v768_v40 }
 0x26d   :  { %v775_v43 = vperm.slane %v770_v41, 1  ;;  %v774_v45 = vperm.slane %v770_v41, 0 }
 0x26f   :  { %v779_v46 = vadd.f32 %v775_v43, %v772_v42  ;;  %v778_v47 = vadd.f32 %v774_v45, %v771_v44 }
 0x271   :  { %vm780_vm5 = vcmp.gt.f32.partialorder %v778_v47, 0.0  ;;  %v782_v48 = vmul.f32 0.25, %v778_v47  ;;  %vm781_vm6 = vcmp.gt.f32.partialorder %v779_v46, 0.0  ;;  %v783_v49 = vmul.f32 0.25, %v779_v46 }
 0x273   :  { %v784_v50 = vsel %vm780_vm5, %v778_v47, %v782_v48  ;;  %v785_v51 = vsel %vm781_vm6, %v779_v46, %v783_v49 }
 0x274   :  { %v818_v52 = vpack.c.bf16 %v784_v50, %v784_v50  ;;  %v819_v53 = vpack.c.bf16 %v785_v51, %v785_v51 }
 0x276   :  { %924 = vmatmul.bf16.vlgmr.msrb.gmra.mxu2 %v818_v52  ;;  %937 = vmatmul.bf16.vlgmr.msrb.gmra.mxu3 %v819_v53 }
 0x2f9   :  { %v925_v23 = vpop.f32.mrf.mxu2  ;;  %v938_v24 = vpop.f32.mrf.mxu3 }
 0x2fa   :  { %v939_v54 = vadd.f32 %v938_v24, %v925_v23 }
 0x2fc   :  { %942 = vst [vmem:[#allocation17] sm:$0xff] %v939_v54 }
 0x2fd   :  { %953 = dma.vmem_to_hbm [thread:$0]  %s949_s11, 128, %s951_s18, [#allocation4]  }
 0x301   :  { %v927_v55 = vpop.f32.mrf.mxu2  ;;  %v940_v56 = vpop.f32.mrf.mxu3 }
 0x302   :  { %1512 = dma.done.wait [#allocation4], 128  }
 0x303   :  { %1513 = vsyncadd [#allocation4], 4294967168 }
 0x304   :  { %958 = vsyncpa [#allocation3], 1 }
 0x305   :  { %959 = vsyncpa [#allocation6], 1 }
 0x306   :  { %960 = vsyncpa [#allocation9], 1 }
 0x307   :  { %961 = vsyncpa [#allocation12], 1 }
 0x308   :  { %962 = vsyncpa [#allocation15], 1 }
 0x309   :  { %963 = vsyncpa [#allocation4], 1 }

</bundles_post_ra>
